<compile_context>
chip_gen: v7x
topology: tpu7x:2x2x1
jax: 0.10.0
libtpu: 0.0.40
codegen_flags: <defaults>
</compile_context>

<pallas_src>
import functools

import jax
import jax.numpy as jnp
from jax.experimental import pallas as pl
from jax.experimental.pallas import tpu as pltpu


def _features_linear_kernel(idx_ref, w_ref, bias_ref, out_ref, *,
                            num_fields: int, total_dims: int):
    # idx_ref:  (F, TB) int32 VMEM -- offset-shifted flat indices, batch on lanes
    # w_ref:    (1, T)  f32  VMEM -- lane-dense flat table (emb dim == 1), resident
    # bias_ref: (1,)    f32  SMEM -- scalar bias
    # out_ref:  (1, TB) f32  VMEM -- lane-dense per-row sums
    tb = out_ref.shape[1]

    # Table-row iota along sublanes; OR-accumulate the boolean match mask over
    # the fields.  Offsets make per-field index ranges disjoint, so each table
    # row matches at most one field and OR is exactly the one-hot count.
    row_iota = jax.lax.broadcasted_iota(jnp.int32, (total_dims, tb), 0)
    mask = row_iota == idx_ref[0:1, :]                    # (T, TB) bool
    for f in range(1, num_fields):                        # static, small field count
        mask = mask | (row_iota == idx_ref[f:f + 1, :])

    # Single select to f32 after the loop, then contract over T on the MXU:
    # (1, T) @ (T, TB) -> (1, TB).  f32 operands with f32 accumulation.
    onehot = jnp.where(mask, jnp.float32(1.0), jnp.float32(0.0))   # (T, TB)
    row_sum = jax.lax.dot_general(
        w_ref[...], onehot,
        dimension_numbers=(((1,), (0,)), ((), ())),
        preferred_element_type=jnp.float32)               # (1, TB)
    out_ref[...] = row_sum + bias_ref[0]


def features_linear(idx, weight, bias, offsets, *, tb=256):
    """idx: (B, F) int; weight: (T, 1) f32; bias: (1,) f32; offsets: (F,) int."""
    B, F = idx.shape
    T = weight.shape[0]
    assert F >= 1
    assert tb % 128 == 0, "batch tile must be a multiple of the 128-lane width"

    # Fold per-field offsets in via plain XLA (scalar/control data stays off the
    # kernel's vector path) and put batch on the minor (lane) axis.
    shifted = idx.astype(jnp.int32) + offsets.reshape(1, F).astype(jnp.int32)
    shifted_t = shifted.T                                 # (F, B)

    b_pad = pl.cdiv(B, tb) * tb
    if b_pad != B:
        # Pad batch with index 0 (a valid lookup); padded lanes are sliced away.
        shifted_t = jnp.pad(shifted_t, ((0, 0), (0, b_pad - B)))

    # Lane-dense weight row, kept fully resident in VMEM (no per-step DMA, no
    # double-buffering -- its block never changes).
    w_row = weight.reshape(1, T).astype(jnp.float32)
    bias_s = bias.reshape(1).astype(jnp.float32)

    kernel = functools.partial(_features_linear_kernel,
                               num_fields=F, total_dims=T)

    out = pl.pallas_call(
        kernel,
        out_shape=jax.ShapeDtypeStruct((1, b_pad), jnp.float32),
        grid_spec=pltpu.PrefetchScalarGridSpec(
            num_scalar_prefetch=0,
            grid=(b_pad // tb,),
            in_specs=[
                pl.BlockSpec((F, tb), lambda i: (0, i)),                # indices (batch on lanes)
                pl.BlockSpec(memory_space=pltpu.MemorySpace.VMEM),      # resident (1, T) table row
                pl.BlockSpec(memory_space=pltpu.MemorySpace.SMEM),      # bias scalar
            ],
            out_specs=pl.BlockSpec((1, tb), lambda i: (0, i)),          # lane-dense output
        ),
        compiler_params=pltpu.CompilerParams(
            dimension_semantics=("parallel",)),
    )(shifted_t, w_row, bias_s)

    # (1, b_pad) lane-dense slab -> (B, 1) module output.
    return out.reshape(b_pad, 1)[:B]


def _reference(idx, weight, bias, offsets):
    shifted = idx + offsets[None, :]
    emb = weight[shifted, 0]                      # (B, F)
    return jnp.sum(emb, axis=1, keepdims=True) + bias[None, :]


if __name__ == "__main__":
    key = jax.random.PRNGKey(0)
    field_dims = [10, 20, 30]                     # small synthetic fields
    num_fields = len(field_dims)
    total_dims = sum(field_dims)
    batch = 8

    # Deterministic parameter init (nn.Embedding default ~ N(0,1); bias = 0).
    k_w, k_x = jax.random.split(key)
    weight = jax.random.normal(k_w, (total_dims, 1), dtype=jnp.float32)
    bias = jnp.zeros((1,), dtype=jnp.float32)

    # Per-field offsets (cumulative sum of preceding field dims).
    offsets = jnp.array(
        [0] + list(jnp.cumsum(jnp.array(field_dims[:-1])).tolist()),
        dtype=jnp.int32)

    # Per-field raw indices in [0, field_dims[f]).
    maxvals = jnp.array(field_dims, dtype=jnp.int32)[None, :]
    idx = (jax.random.randint(k_x, (batch, num_fields), 0, 1 << 20) % maxvals
           ).astype(jnp.int32)

    out = features_linear(idx, weight, bias, offsets, tb=256)
    out = jax.block_until_ready(out)

    ref = _reference(idx, weight, bias, offsets)
    assert out.shape == (batch, 1)
    assert jnp.allclose(out, ref, atol=1e-5, rtol=1e-5), (out, ref)

    print("KERNEL_OK")
</pallas_src>

<mosaic_0001>
module attributes {stable_mosaic.version = 11 : i64} {
  func.func @_features_linear_kernel(%arg0: i32, %arg1: memref<3x256xi32, #tpu.memory_space<vmem>>, %arg2: memref<1x60xf32, #tpu.memory_space<vmem>>, %arg3: memref<1xf32, #tpu.memory_space<smem>>, %arg4: memref<1x256xf32, #tpu.memory_space<vmem>>) attributes {dimension_semantics = [#tpu.dimension_semantics<parallel>], iteration_bounds = array<i64: 1>, scalar_prefetch = 0 : i64, scratch_operands = 0 : i64, tpu.core_type = #tpu.core_type<tc>, window_params = [{transform_indices = @transform_0, window_bounds = array<i64: 3, 256>}, {pipeline_mode = #tpu.pipeline_mode<synchronous>, transform_indices = @transform_1, window_bounds = array<i64: 1, 60>}, {transform_indices = @transform_2, window_bounds = array<i64: 1>}, {transform_indices = @transform_3, window_bounds = array<i64: 1, 256>}]} {
    %0 = tpu.iota {dimensions = array<i32: 0>} : vector<60x256xi32>
    %c0 = arith.constant 0 : index
    %c0_0 = arith.constant 0 : index
    %1 = vector.load %arg1[%c0, %c0_0] : memref<3x256xi32, #tpu.memory_space<vmem>>, vector<1x256xi32>
    %2 = vector.broadcast %1 : vector<1x256xi32> to vector<60x256xi32>
    %3 = arith.cmpi eq, %0, %2 : vector<60x256xi32>
    %c1 = arith.constant 1 : index
    %c0_1 = arith.constant 0 : index
    %4 = vector.load %arg1[%c1, %c0_1] : memref<3x256xi32, #tpu.memory_space<vmem>>, vector<1x256xi32>
    %5 = vector.broadcast %4 : vector<1x256xi32> to vector<60x256xi32>
    %6 = arith.cmpi eq, %0, %5 : vector<60x256xi32>
    %7 = arith.ori %3, %6 : vector<60x256xi1>
    %c2 = arith.constant 2 : index
    %c0_2 = arith.constant 0 : index
    %8 = vector.load %arg1[%c2, %c0_2] : memref<3x256xi32, #tpu.memory_space<vmem>>, vector<1x256xi32>
    %9 = vector.broadcast %8 : vector<1x256xi32> to vector<60x256xi32>
    %10 = arith.cmpi eq, %0, %9 : vector<60x256xi32>
    %11 = arith.ori %7, %10 : vector<60x256xi1>
    %cst = arith.constant 1.000000e+00 : f32
    %cst_3 = arith.constant 0.000000e+00 : f32
    %12 = vector.broadcast %cst : f32 to vector<60x256xf32>
    %13 = vector.broadcast %cst_3 : f32 to vector<60x256xf32>
    %14 = arith.select %11, %12, %13 : vector<60x256xi1>, vector<60x256xf32>
    %c0_4 = arith.constant 0 : index
    %c0_5 = arith.constant 0 : index
    %15 = vector.load %arg2[%c0_4, %c0_5] : memref<1x60xf32, #tpu.memory_space<vmem>>, vector<1x60xf32>
    %cst_6 = arith.constant dense<0.000000e+00> : vector<1x256xf32>
    %16 = tpu.matmul %15, %14, %cst_6 {dimension_numbers = #tpu.dot_dimension_numbers<[1], [0], [0], [1], [0, 0, 1, 1], [], []>} : vector<1x60xf32>, vector<60x256xf32>, vector<1x256xf32> -> vector<1x256xf32>
    %c0_7 = arith.constant 0 : index
    %17 = memref.load %arg3[%c0_7] : memref<1xf32, #tpu.memory_space<smem>>
    %18 = vector.broadcast %17 : f32 to vector<1x256xf32>
    %19 = arith.addf %16, %18 : vector<1x256xf32>
    %c0_8 = arith.constant 0 : index
    %c0_9 = arith.constant 0 : index
    %20 = vector.load %arg4[%c0_8, %c0_9] : memref<1x256xf32, #tpu.memory_space<vmem>>, vector<1x256xf32>
    tpu.vector_store %arg4[%c0_8, %c0_9], %19 {strides = array<i32>} : memref<1x256xf32, #tpu.memory_space<vmem>>, vector<1x256xf32>,
    return
  }
  func.func @transform_0(%arg0: i32) -> (i32, i32) {
    %c0_i32 = arith.constant 0 : i32
    %c0_i32_0 = arith.constant 0 : i32
    return %c0_i32, %arg0 : i32, i32
  }
  func.func @transform_1(%arg0: i32) -> (i32, i32) {
    %c0_i32 = arith.constant 0 : i32
    %c0_i32_0 = arith.constant 0 : i32
    %c0_i32_1 = arith.constant 0 : i32
    return %c0_i32, %c0_i32_0 : i32, i32
  }
  func.func @transform_2(%arg0: i32) -> i32 {
    %c0_i32 = arith.constant 0 : i32
    %c0_i32_0 = arith.constant 0 : i32
    return %c0_i32 : i32
  }
  func.func @transform_3(%arg0: i32) -> (i32, i32) {
    %c0_i32 = arith.constant 0 : i32
    %c0_i32_0 = arith.constant 0 : i32
    return %c0_i32, %arg0 : i32, i32
  }
}

</mosaic_0001>

<bundles_post_ra>
// kernel: tpu_custom_call.1
= control target key start
LH: loop header
LB: loop body
LE: loop exit
PB: predicated region body
PF: predicated region fallthrough
CT: control target
= control target key end

     0   :  { %9 = vsyncpa [#allocation4], 0  ;;  %s521_s0 = inlined_call_operand.hbm [shape: s32[3,256], index: 0, kind: input, shape index: {}]   ;;  %s522_s1 = inlined_call_operand.vmem [shape: f32[1,60], index: 1, kind: input, shape index: {}]   ;;  %s523_s2 = inlined_call_operand.<no memory space> [shape: f32[1], index: 2, kind: input, shape index: {}]   ;;  %s524_s3 = inlined_call_operand.hbm [shape: f32[1,256], index: 3, kind: output, shape index: {}]  }
   0x1   :  { %10 = vsyncpa [#allocation5], 0  ;;  %s374_s12 = smov [#allocation3]   ;;  %s326_s16 = scalar_lea.hbm %s521_s0, 128 }
   0x2   :  { %s17_s13 = sshll.u32 %s374_s12, 4  ;;  %p327_p0 = scmp.ne.s32.totalorder %s521_s0, %s326_s16  ;;  %s18_s13 = int_to_ptr.vmem [resolvable:$true] %s17_s13 }
   0x3   :  { %p330_p1 = scmp.lt.u32.totalorder %s326_s16, %s521_s0 }
   0x5   :  { %p332_p2 = pnand %p330_p1, %p327_p0 }
   0x7   :  { %335 = shalt.err (!%p332_p2)
}
   0x8   :  { %s336_s21 = scalar_lea.vmem %s18_s13, 128  ;;  %p341_p4 = scmp.lt.s32.totalorder %s18_s13, %s18_s13 }
   0x9   :  { %p337_p3 = scmp.ne.s32.totalorder %s18_s13, %s336_s21  ;;  %p342_p5 = scmp.lt.s32.totalorder %s336_s21, %s336_s21 }
   0xb   :  { %p343_p6 = por %p342_p5, %p341_p4 }
   0xd   :  { %p344_p7 = pnand %p343_p6, %p337_p3 }
   0xf   :  { %347 = shalt.err (!%p344_p7)
}
  0x10   :  { %20 = dma.hbm_to_vmem [thread:$0]  %s521_s0, 128, %s18_s13, [#allocation4]  }
  0x11   :  { %370 = dma.done.wait [#allocation4], 128  }
  0x12   :  { %371 = vsyncadd [#allocation4], 4294967168  ;;  %v28_v0 = vlaneseq  ;;  %v375_v1 = vmov 0.0   ;;  %v37_v6 = vld [vmem:[#allocation3] ss:$4 sm:$0x3]  ;;  %v164_v30 = vstv %s523_s2 }
  0x13   :  { %240 = vmatprep.mubr.f32.mxu0 %v375_v1  ;;  %v63_v7 = vld [vmem:[#allocation3 + $0x1] ss:$4 sm:$0x3]  ;;  %v105_v10 = vld [vmem:[#allocation3 + $0x2] ss:$4 sm:$0x3] }
  0x14   :  { %v414_v2 = vshrl.u32 %v28_v0, 7  ;;  %v376_v17 = vmov 1.0|1.0   ;;  %v377_v23 = vmov 1.0   ;;  %v162_v27 = vld [vmem:[%s522_s1] sm:$0x1] }
  0x15   :  { %v378_v28 = vmov 1966171168   ;;  %s379_s27 = smov [#allocation6]  }
  0x16   :  { %v44_v3 = vsub.s32 1, %v414_v2  ;;  %v40_v4 = vsub.s32 0, %v414_v2  ;;  %v30_v5 = vadd.s32 8, %v414_v2  ;;  %v31_v15 = vadd.s32 16, %v414_v2  ;;  %s276_s28 = sshll.u32 %s379_s27, 4  ;;  %s277_s28 = int_to_ptr.vmem [resolvable:$true] %s276_s28 }
  0x17   :  { %v32_v16 = vadd.s32 24, %v414_v2  ;;  %v33_v18 = vadd.s32 32, %v414_v2  ;;  %v34_v19 = vadd.s32 40, %v414_v2  ;;  %v35_v20 = vadd.s32 48, %v414_v2  ;;  %s348_s1 = scalar_lea.vmem %s277_s28, 32  ;;  %p353_p9 = scmp.lt.s32.totalorder %s277_s28, %s277_s28 }
  0x18   :  { %v419_v8 = vrot.slane %v37_v6, %v44_v3  ;;  %v421_v9 = vrot.slane %v63_v7, %v44_v3  ;;  %v423_v11 = vrot.slane %v105_v10, %v44_v3  ;;  %v425_v12 = vrot.slane %v37_v6, %v40_v4  ;;  %p349_p8 = scmp.ne.s32.totalorder %s277_s28, %s348_s1  ;;  %p354_p10 = scmp.lt.s32.totalorder %s348_s1, %s348_s1 }
  0x19   :  { %v427_v13 = vrot.slane %v63_v7, %v40_v4  ;;  %v438_v14 = vrot.slane %v105_v10, %v40_v4  ;;  %v36_v21 = vadd.s32 56, %v414_v2  ;;  %v251_v29 = vunpack.c.l.s4 %v378_v28 }
  0x1a   :  { %vm47_vm0 = vcmp.eq.s32.totalorder %v414_v2, %v419_v8  ;;  %vm49_vm1 = vcmp.eq.s32.totalorder %v30_v5, %v419_v8  ;;  %vm73_vm2 = vcmp.eq.s32.totalorder %v414_v2, %v421_v9  ;;  %vm75_vm3 = vcmp.eq.s32.totalorder %v30_v5, %v421_v9  ;;  %p355_p11 = por %p354_p10, %p353_p9 }
  0x1b   :  { %vm89_vm4 = vmor %vm47_vm0, %vm73_vm2  ;;  %vm115_vm5 = vcmp.eq.s32.totalorder %v414_v2, %v423_v11  ;;  %vm117_vm6 = vcmp.eq.s32.totalorder %v30_v5, %v423_v11  ;;  %vm46_vm9 = vcmp.eq.s32.totalorder %v414_v2, %v425_v12  ;;  %vm72_vm10 = vcmp.eq.s32.totalorder %v414_v2, %v427_v13 }
  0x1c   :  { %vm91_vm7 = vmor %vm49_vm1, %vm75_vm3  ;;  %vm48_vm12 = vcmp.eq.s32.totalorder %v30_v5, %v425_v12  ;;  %vm74_vm13 = vcmp.eq.s32.totalorder %v30_v5, %v427_v13  ;;  %vm114_vm15 = vcmp.eq.s32.totalorder %v414_v2, %v438_v14  ;;  %vm116_vm1 = vcmp.eq.s32.totalorder %v30_v5, %v438_v14  ;;  %p356_p12 = pnand %p355_p11, %p349_p8 }
  0x1d   :  { %vm131_vm8 = vmor %vm89_vm4, %vm115_vm5  ;;  %vm51_vm4 = vcmp.eq.s32.totalorder %v31_v15, %v419_v8  ;;  %vm77_vm5 = vcmp.eq.s32.totalorder %v31_v15, %v421_v9  ;;  %v252_v31 = vunpack.c.0.s8 %v251_v29 }
  0x1e   :  { %vm133_vm11 = vmor %vm91_vm7, %vm117_vm6  ;;  %vm53_vm7 = vcmp.eq.s32.totalorder %v32_v16, %v419_v8 }
  0x1f   :  { %vm302_vm14 = vmpackc.low %vm133_vm11, %vm131_vm8  ;;  %vm79_vm8 = vcmp.eq.s32.totalorder %v32_v16, %v421_v9  ;;  %v255_v36 = vsub.s32 %v252_v31, %v414_v2 }
  0x20   :  { %303 = vmatprep.subr.msk.bf16.mxu0 %vm302_vm14, %v376_v17  ;;  %vm88_vm0 = vmor %vm46_vm9, %vm72_vm10  ;;  %vm119_vm14 = vcmp.eq.s32.totalorder %v31_v15, %v423_v11  ;;  %vm121_vm10 = vcmp.eq.s32.totalorder %v32_v16, %v423_v11 }
  0x21   :  { %vm90_vm2 = vmor %vm48_vm12, %vm74_vm13 }
  0x22   :  { %vm130_vm3 = vmor %vm88_vm0, %vm114_vm15  ;;  %vm50_vm15 = vcmp.eq.s32.totalorder %v31_v15, %v425_v12  ;;  %vm76_vm0 = vcmp.eq.s32.totalorder %v31_v15, %v427_v13 }
  0x23   :  { %vm132_vm6 = vmor %vm90_vm2, %vm116_vm1  ;;  %vm52_vm2 = vcmp.eq.s32.totalorder %v32_v16, %v425_v12 }
  0x24   :  { %vm304_vm11 = vmpackc.low %vm132_vm6, %vm130_vm3  ;;  %vm78_vm3 = vcmp.eq.s32.totalorder %v32_v16, %v427_v13 }
  0x25   :  { %305 = vmatpush1.bf16.msk.msra.mxu0 %vm304_vm11, %v376_v17  ;;  %vm93_vm9 = vmor %vm51_vm4, %vm77_vm5  ;;  %vm118_vm11 = vcmp.eq.s32.totalorder %v31_v15, %v438_v14  ;;  %vm120_vm5 = vcmp.eq.s32.totalorder %v32_v16, %v438_v14 }
  0x26   :  { %vm95_vm12 = vmor %vm53_vm7, %vm79_vm8 }
  0x27   :  { %vm135_vm13 = vmor %vm93_vm9, %vm119_vm14  ;;  %vm55_vm14 = vcmp.eq.s32.totalorder %v33_v18, %v419_v8  ;;  %vm81_vm9 = vcmp.eq.s32.totalorder %v33_v18, %v421_v9 }
  0x28   :  { %vm137_vm1 = vmor %vm95_vm12, %vm121_vm10  ;;  %vm57_vm12 = vcmp.eq.s32.totalorder %v34_v19, %v419_v8 }
  0x29   :  { %vm306_vm6 = vmpackc.low %vm137_vm1, %vm135_vm13  ;;  %vm83_vm13 = vcmp.eq.s32.totalorder %v34_v19, %v421_v9 }
  0x2a   :  { %307 = vmatprep.subr.msk.bf16.mxu0 %vm306_vm6, %v376_v17  ;;  %vm92_vm4 = vmor %vm50_vm15, %vm76_vm0  ;;  %vm123_vm6 = vcmp.eq.s32.totalorder %v33_v18, %v423_v11  ;;  %vm125_vm15 = vcmp.eq.s32.totalorder %v34_v19, %v423_v11 }
  0x2b   :  { %vm94_vm7 = vmor %vm52_vm2, %vm78_vm3 }
  0x2c   :  { %vm134_vm8 = vmor %vm92_vm4, %vm118_vm11  ;;  %vm54_vm11 = vcmp.eq.s32.totalorder %v33_v18, %v425_v12  ;;  %vm80_vm4 = vcmp.eq.s32.totalorder %v33_v18, %v427_v13 }
  0x2d   :  { %vm136_vm10 = vmor %vm94_vm7, %vm120_vm5  ;;  %vm56_vm7 = vcmp.eq.s32.totalorder %v34_v19, %v425_v12 }
  0x2e   :  { %vm308_vm1 = vmpackc.low %vm136_vm10, %vm134_vm8  ;;  %vm82_vm8 = vcmp.eq.s32.totalorder %v34_v19, %v427_v13 }
  0x2f   :  { %309 = vmatpush1.bf16.msk.msra.mxu0 %vm308_vm1, %v376_v17  ;;  %vm97_vm0 = vmor %vm55_vm14, %vm81_vm9  ;;  %vm122_vm1 = vcmp.eq.s32.totalorder %v33_v18, %v438_v14  ;;  %vm124_vm9 = vcmp.eq.s32.totalorder %v34_v19, %v438_v14 }
  0x30   :  { %vm99_vm2 = vmor %vm57_vm12, %vm83_vm13 }
  0x31   :  { %vm139_vm3 = vmor %vm97_vm0, %vm123_vm6  ;;  %vm59_vm6 = vcmp.eq.s32.totalorder %v35_v20, %v419_v8  ;;  %vm85_vm0 = vcmp.eq.s32.totalorder %v35_v20, %v421_v9 }
  0x32   :  { %vm141_vm5 = vmor %vm99_vm2, %vm125_vm15  ;;  %vm61_vm2 = vcmp.eq.s32.totalorder %v36_v21, %v419_v8 }
  0x33   :  { %vm310_vm10 = vmpackc.low %vm141_vm5, %vm139_vm3  ;;  %vm87_vm3 = vcmp.eq.s32.totalorder %v36_v21, %v421_v9 }
  0x34   :  { %311 = vmatprep.subr.msk.bf16.mxu0 %vm310_vm10, %v376_v17  ;;  %vm96_vm14 = vmor %vm54_vm11, %vm80_vm4  ;;  %vm127_vm10 = vcmp.eq.s32.totalorder %v35_v20, %v423_v11  ;;  %vm129_vm11 = vcmp.eq.s32.totalorder %v36_v21, %v423_v11 }
  0x35   :  { %vm98_vm12 = vmor %vm56_vm7, %vm82_vm8  ;;  %vm169_vm8 = vcmask 1043456  }
  0x36   :  { %vm138_vm13 = vmor %vm96_vm14, %vm122_vm1  ;;  %vm58_vm14 = vcmp.eq.s32.totalorder %v35_v20, %v425_v12 }
  0x37   :  { %vm140_vm15 = vmor %vm98_vm12, %vm124_vm9  ;;  %vm84_vm9 = vcmp.eq.s32.totalorder %v35_v20, %v427_v13 }
  0x38   :  { %vm312_vm5 = vmpackc.low %vm140_vm15, %vm138_vm13  ;;  %vm60_vm13 = vcmp.eq.s32.totalorder %v36_v21, %v425_v12  ;;  %vm86_vm15 = vcmp.eq.s32.totalorder %v36_v21, %v427_v13 }
  0x39   :  { %313 = vmatpush1.bf16.msk.msra.mxu0 %vm312_vm5, %v376_v17  ;;  %vm101_vm4 = vmor %vm59_vm6, %vm85_vm0  ;;  %vm126_vm6 = vcmp.eq.s32.totalorder %v35_v20, %v438_v14 }
  0x3a   :  { %vm103_vm7 = vmor %vm61_vm2, %vm87_vm3  ;;  %vm128_vm2 = vcmp.eq.s32.totalorder %v36_v21, %v438_v14 }
  0x3b   :  { %vm143_vm1 = vmor %vm101_vm4, %vm127_vm10 }
  0x3c   :  { %vm145_vm12 = vmor %vm103_vm7, %vm129_vm11  ;;  %vm165_vm7 = vcmask 490496  }
  0x3d   :  { %v161_v22 = vsel %vm145_vm12, 1.0, %v375_v1  ;;  %vm315_vm5 = vmpackc.low %vm169_vm8, %vm143_vm1 }
  0x3e   :  { %v314_v24 = vpack.c.bf16 %v161_v22, %v377_v23  ;;  %vm100_vm0 = vmor %vm58_vm14, %vm84_vm9 }
  0x3f   :  { %vm102_vm3 = vmor %vm60_vm13, %vm86_vm15 }
  0x40   :  { %316 = vmatprep.subr.msk.bf16.mxu0 %vm315_vm5, %v314_v24  ;;  %vm142_vm10 = vmor %vm100_vm0, %vm126_vm6 }
  0x41   :  { %vm144_vm4 = vmor %vm102_vm3, %vm128_vm2 }
  0x42   :  { %v160_v25 = vsel %vm144_vm4, 1.0, %v375_v1  ;;  %vm318_vm11 = vmpackc.low %vm169_vm8, %vm142_vm10  ;;  %vm267_vm8 = vcmp.lt.s32.totalorder %v28_v0, 256 }
  0x43   :  { %v317_v26 = vpack.c.bf16 %v160_v25, %v377_v23 }
  0x45   :  { %319 = vmatpush1.bf16.msk.msra.mxu0 %vm318_vm11, %v317_v26 }
  0x48   :  { %301 = vmatmul.mubr.msk.f32.vlgmr.msra.gmra.mrb[0].mxu0 %vm165_vm7, %v162_v27 }
 0x11b   :  { %v242_v32 = vpop.f32.mrb[0].mxu0 }
 0x11c   :  { %v243_v33 = vadd.f32 %v242_v32, %v164_v30  ;;  %v244_v34 = vpop.f32.mrb[1].mxu0 }
 0x11d   :  { %v245_v35 = vadd.f32 %v244_v34, %v164_v30 }
 0x11f   :  { %v249_v37 = vcombine.low %v243_v33, %v245_v35 }
 0x121   :  { %v256_v38 = vrot.slane %v249_v37, %v255_v36 }
 0x123   :  { %v263_v39 = vrot.slane %v256_v38, %v255_v36 }
 0x125   :  { %269 = vst.msk [vmem:[#allocation6] sm:$0x3] %vm267_vm8, %v263_v39 }
 0x126   :  { %359 = shalt.err (!%p356_p12)
}
 0x127   :  { %s360_s30 = scalar_lea.hbm %s524_s3, 32 }
 0x128   :  { %p361_p13 = scmp.ne.s32.totalorder %s524_s3, %s360_s30  ;;  %p364_p0 = scmp.lt.u32.totalorder %s360_s30, %s524_s3 }
 0x12a   :  { %p366_p1 = pnand %p364_p0, %p361_p13 }
 0x12c   :  { %369 = shalt.err (!%p366_p1)
}
 0x12d   :  { %279 = dma.vmem_to_hbm [thread:$0]  %s277_s28, 32, %s524_s3, [#allocation5]  }
 0x12e   :  { %372 = dma.done.wait [#allocation5], 32  }
 0x12f   :  { %373 = vsyncadd [#allocation5], 4294967264 }
 0x130   :  { %283 = vsyncpa [#allocation4], 1 }
 0x131   :  { %284 = vsyncpa [#allocation5], 1 }

</bundles_post_ra>
